<compile_context>
chip_gen: v5e
topology: v5e:2x2
jax: 0.10.0
libtpu: 0.0.40
codegen_flags: <defaults>
</compile_context>

<pallas_src>
import jax
import jax.numpy as jnp
from jax.experimental import pallas as pl
from jax.experimental.pallas import tpu as pltpu


def rnn_kernel(x_ref, hprev_ref, wxh_ref, whh_ref, bh_ref, why_ref, by_ref,
               y_ref, hlast_ref, h_all, bias_all):
    """Single invocation: whole sequence, recurrence fully unrolled in-kernel."""
    T = x_ref.shape[0]
    N = whh_ref.shape[0]          # == B == I == H == O (module quirk)

    whh = whh_ref[...]            # (N, N)
    why = why_ref[...]            # (N, N)

    # --- hoisted input projection: a_all[t, c] = sum_k Wxh[c, k] * x[t, k] ---
    # One (T, B) x (H, I)^T matmul instead of T degenerate matvecs.
    a_all = jax.lax.dot_general(
        x_ref[...], wxh_ref[...],
        dimension_numbers=(((1,), (1,)), ((), ())),
        preferred_element_type=jnp.float32)                    # (T, N)

    # --- hoisted per-step bias (off the serial chain, staged in VMEM) ---
    #   bias_all[t, r, c] = a_all[t, c]   (row-broadcast of Wxh@x_t)
    #                     + bh[r, 0]      (column-broadcast of bh)
    bias_all[...] = a_all[:, None, :] + bh_ref[...][None]      # (T, N, N)

    # --- hoisted output-bias column-broadcast (done once, not per step) ---
    by_b = jnp.broadcast_to(by_ref[...], (N, N))               # (N,1) -> (N,N)

    # --- sequential recurrence, fully unrolled (T is small and static) ---
    # h_all[t] = h is a leading-axis, tile-aligned block store: no lane
    # offsets, no XLU rotates, no masked-store lane math on the serial chain.
    h = hprev_ref[...]                                          # (N, N)
    for t in range(T):
        rec = jnp.dot(whh, h, preferred_element_type=jnp.float32)  # Whh @ h[t-1]
        h = jnp.tanh(rec + bias_all[t])                             # (N, N)
        h_all[t] = h

    # final hidden state (h[T-1]) written exactly once
    hlast_ref[...] = h

    # --- output projection, hoisted out of the serial chain ---
    # T independent (O,H)x(H,N) matmuls (MXU-pipelined, no data dependence);
    # each y_ref[t] write is a leading-axis, tile-aligned block store directly
    # into the (T, B, O) output (replaces the old 32-lane-offset scatter loop).
    for t in range(T):
        y_ref[t] = jnp.dot(why, h_all[t],
                           preferred_element_type=jnp.float32) + by_b


def rnn_forward(inputs, h_prev, wxh, whh, bh, why, by):
    T, B = inputs.shape
    H = wxh.shape[0]
    O = why.shape[0]
    # The module's forward is only well-typed when these all coincide.
    assert B == wxh.shape[1] == H == O, "module requires B == I == H == O"

    vmem = pl.BlockSpec(memory_space=pltpu.MemorySpace.VMEM)

    y, h_last = pl.pallas_call(
        rnn_kernel,
        out_shape=(jax.ShapeDtypeStruct((T, B, O), jnp.float32),
                   jax.ShapeDtypeStruct((B, H), jnp.float32)),
        in_specs=[vmem] * 7,          # whole arrays resident in VMEM, no grid
        out_specs=(vmem, vmem),
        scratch_shapes=[
            pltpu.VMEM((T, H, B), jnp.float32),   # h_all: staged hidden states
            pltpu.VMEM((T, H, B), jnp.float32),   # bias_all: precomputed a_t + bh
        ],
    )(inputs, h_prev, wxh, whh, bh, why, by)
    return y, h_last


def rnn_reference(inputs, h_prev, wxh, whh, bh, why, by):
    """Pure-JAX transcription of the PyTorch forward (quirks included)."""
    T, _ = inputs.shape
    h = h_prev
    ys = []
    for t in range(T):
        a = wxh @ inputs[t]                 # (H,)
        h = jnp.tanh(a + whh @ h + bh)      # (H,) row-bcast + (H,1) col-bcast
        ys.append(why @ h + by)
    return jnp.stack(ys, axis=0), h


if __name__ == "__main__":
    # The module's forward requires input_size == hidden_size == output_size == batch_size.
    N = 32
    T = 8

    key = jax.random.PRNGKey(0)
    k1, k2, k3, k4, k5 = jax.random.split(key, 5)

    # Deterministic parameter init mirroring the module's __init__.
    wxh = 0.01 * jax.random.normal(k1, (N, N), jnp.float32)   # (hidden, input)
    whh = 0.01 * jax.random.normal(k2, (N, N), jnp.float32)   # (hidden, hidden)
    bh  = jnp.zeros((N, 1), jnp.float32)                      # (hidden, 1)
    why = 0.01 * jax.random.normal(k3, (N, N), jnp.float32)   # (output, hidden)
    by  = jnp.zeros((N, 1), jnp.float32)                      # (output, 1)

    inputs = jax.random.normal(k4, (T, N), jnp.float32)       # (seq, batch)
    h_prev = jax.random.normal(k5, (N, N), jnp.float32)       # (batch, hidden)

    y, h_last = jax.block_until_ready(
        rnn_forward(inputs, h_prev, wxh, whh, bh, why, by))

    y_ref, h_ref = rnn_reference(inputs, h_prev, wxh, whh, bh, why, by)
    assert y.shape == (T, N, N) and h_last.shape == (N, N)
    assert jnp.allclose(y, y_ref, atol=1e-5, rtol=1e-5)
    assert jnp.allclose(h_last, h_ref, atol=1e-5, rtol=1e-5)
    print("KERNEL_OK")
</pallas_src>

<mosaic_0001>
module attributes {stable_mosaic.version = 11 : i64} {
  func.func @rnn_kernel(%arg0: memref<8x32xf32, #tpu.memory_space<vmem>>, %arg1: memref<32x32xf32, #tpu.memory_space<vmem>>, %arg2: memref<32x32xf32, #tpu.memory_space<vmem>>, %arg3: memref<32x32xf32, #tpu.memory_space<vmem>>, %arg4: memref<32x1xf32, #tpu.memory_space<vmem>>, %arg5: memref<32x32xf32, #tpu.memory_space<vmem>>, %arg6: memref<32x1xf32, #tpu.memory_space<vmem>>, %arg7: memref<8x32x32xf32, #tpu.memory_space<vmem>>, %arg8: memref<32x32xf32, #tpu.memory_space<vmem>>, %arg9: memref<8x32x32xf32, #tpu.memory_space<vmem>>, %arg10: memref<8x32x32xf32, #tpu.memory_space<vmem>>) attributes {dimension_semantics = [], scalar_prefetch = 0 : i64, scratch_operands = 2 : i64, tpu.core_type = #tpu.core_type<tc>} {
    %c0 = arith.constant 0 : index
    %c0_0 = arith.constant 0 : index
    %0 = vector.load %arg3[%c0, %c0_0] : memref<32x32xf32, #tpu.memory_space<vmem>>, vector<32x32xf32>
    %c0_1 = arith.constant 0 : index
    %c0_2 = arith.constant 0 : index
    %1 = vector.load %arg5[%c0_1, %c0_2] : memref<32x32xf32, #tpu.memory_space<vmem>>, vector<32x32xf32>
    %c0_3 = arith.constant 0 : index
    %c0_4 = arith.constant 0 : index
    %2 = vector.load %arg0[%c0_3, %c0_4] : memref<8x32xf32, #tpu.memory_space<vmem>>, vector<8x32xf32>
    %c0_5 = arith.constant 0 : index
    %c0_6 = arith.constant 0 : index
    %3 = vector.load %arg2[%c0_5, %c0_6] : memref<32x32xf32, #tpu.memory_space<vmem>>, vector<32x32xf32>
    %cst = arith.constant dense<0.000000e+00> : vector<8x32xf32>
    %4 = tpu.matmul %2, %3, %cst {dimension_numbers = #tpu.dot_dimension_numbers<[1], [1], [0], [0], [0, 0, 1, 0], [], []>} : vector<8x32xf32>, vector<32x32xf32>, vector<8x32xf32> -> vector<8x32xf32>
    %5 = vector.shape_cast %4 : vector<8x32xf32> to vector<8x1x32xf32>
    %c0_7 = arith.constant 0 : index
    %c0_8 = arith.constant 0 : index
    %6 = vector.load %arg4[%c0_7, %c0_8] : memref<32x1xf32, #tpu.memory_space<vmem>>, vector<32x1xf32>
    %7 = vector.shape_cast %6 : vector<32x1xf32> to vector<1x32x1xf32>
    %8 = vector.broadcast %5 : vector<8x1x32xf32> to vector<8x32x32xf32>
    %9 = vector.broadcast %7 : vector<1x32x1xf32> to vector<8x32x32xf32>
    %10 = arith.addf %8, %9 : vector<8x32x32xf32>
    %c0_9 = arith.constant 0 : index
    %c0_10 = arith.constant 0 : index
    %c0_11 = arith.constant 0 : index
    %11 = vector.load %arg10[%c0_9, %c0_10, %c0_11] : memref<8x32x32xf32, #tpu.memory_space<vmem>>, vector<8x32x32xf32>
    tpu.vector_store %arg10[%c0_9, %c0_10, %c0_11], %10 {strides = array<i32>} : memref<8x32x32xf32, #tpu.memory_space<vmem>>, vector<8x32x32xf32>,
    %c0_12 = arith.constant 0 : index
    %c0_13 = arith.constant 0 : index
    %12 = vector.load %arg6[%c0_12, %c0_13] : memref<32x1xf32, #tpu.memory_space<vmem>>, vector<32x1xf32>
    %13 = vector.shape_cast %12 : vector<32x1xf32> to vector<32x1xf32>
    %14 = vector.broadcast %13 : vector<32x1xf32> to vector<32x32xf32>
    %c0_14 = arith.constant 0 : index
    %c0_15 = arith.constant 0 : index
    %15 = vector.load %arg1[%c0_14, %c0_15] : memref<32x32xf32, #tpu.memory_space<vmem>>, vector<32x32xf32>
    %cst_16 = arith.constant dense<0.000000e+00> : vector<32x32xf32>
    %16 = tpu.matmul %0, %15, %cst_16 {dimension_numbers = #tpu.dot_dimension_numbers<[1], [0], [0], [1], [0, 0, 1, 1], [], []>} : vector<32x32xf32>, vector<32x32xf32>, vector<32x32xf32> -> vector<32x32xf32>
    %c0_17 = arith.constant 0 : index
    %c0_18 = arith.constant 0 : index
    %c0_19 = arith.constant 0 : index
    %17 = vector.load %arg10[%c0_17, %c0_18, %c0_19] : memref<8x32x32xf32, #tpu.memory_space<vmem>>, vector<1x32x32xf32>
    %18 = vector.shape_cast %17 : vector<1x32x32xf32> to vector<32x32xf32>
    %19 = arith.addf %16, %18 : vector<32x32xf32>
    %20 = math.tanh %19 : vector<32x32xf32>
    %c0_20 = arith.constant 0 : index
    %c0_21 = arith.constant 0 : index
    %c0_22 = arith.constant 0 : index
    %21 = vector.load %arg9[%c0_20, %c0_21, %c0_22] : memref<8x32x32xf32, #tpu.memory_space<vmem>>, vector<1x32x32xf32>
    %22 = vector.shape_cast %21 : vector<1x32x32xf32> to vector<32x32xf32>
    %23 = vector.shape_cast %20 : vector<32x32xf32> to vector<1x32x32xf32>
    tpu.vector_store %arg9[%c0_20, %c0_21, %c0_22], %23 {strides = array<i32>} : memref<8x32x32xf32, #tpu.memory_space<vmem>>, vector<1x32x32xf32>,
    %cst_23 = arith.constant dense<0.000000e+00> : vector<32x32xf32>
    %24 = tpu.matmul %0, %20, %cst_23 {dimension_numbers = #tpu.dot_dimension_numbers<[1], [0], [0], [1], [0, 0, 1, 1], [], []>} : vector<32x32xf32>, vector<32x32xf32>, vector<32x32xf32> -> vector<32x32xf32>
    %c1 = arith.constant 1 : index
    %c0_24 = arith.constant 0 : index
    %c0_25 = arith.constant 0 : index
    %25 = vector.load %arg10[%c1, %c0_24, %c0_25] : memref<8x32x32xf32, #tpu.memory_space<vmem>>, vector<1x32x32xf32>
    %26 = vector.shape_cast %25 : vector<1x32x32xf32> to vector<32x32xf32>
    %27 = arith.addf %24, %26 : vector<32x32xf32>
    %28 = math.tanh %27 : vector<32x32xf32>
    %c1_26 = arith.constant 1 : index
    %c0_27 = arith.constant 0 : index
    %c0_28 = arith.constant 0 : index
    %29 = vector.load %arg9[%c1_26, %c0_27, %c0_28] : memref<8x32x32xf32, #tpu.memory_space<vmem>>, vector<1x32x32xf32>
    %30 = vector.shape_cast %29 : vector<1x32x32xf32> to vector<32x32xf32>
    %31 = vector.shape_cast %28 : vector<32x32xf32> to vector<1x32x32xf32>
    tpu.vector_store %arg9[%c1_26, %c0_27, %c0_28], %31 {strides = array<i32>} : memref<8x32x32xf32, #tpu.memory_space<vmem>>, vector<1x32x32xf32>,
    %cst_29 = arith.constant dense<0.000000e+00> : vector<32x32xf32>
    %32 = tpu.matmul %0, %28, %cst_29 {dimension_numbers = #tpu.dot_dimension_numbers<[1], [0], [0], [1], [0, 0, 1, 1], [], []>} : vector<32x32xf32>, vector<32x32xf32>, vector<32x32xf32> -> vector<32x32xf32>
    %c2 = arith.constant 2 : index
    %c0_30 = arith.constant 0 : index
    %c0_31 = arith.constant 0 : index
    %33 = vector.load %arg10[%c2, %c0_30, %c0_31] : memref<8x32x32xf32, #tpu.memory_space<vmem>>, vector<1x32x32xf32>
    %34 = vector.shape_cast %33 : vector<1x32x32xf32> to vector<32x32xf32>
    %35 = arith.addf %32, %34 : vector<32x32xf32>
    %36 = math.tanh %35 : vector<32x32xf32>
    %c2_32 = arith.constant 2 : index
    %c0_33 = arith.constant 0 : index
    %c0_34 = arith.constant 0 : index
    %37 = vector.load %arg9[%c2_32, %c0_33, %c0_34] : memref<8x32x32xf32, #tpu.memory_space<vmem>>, vector<1x32x32xf32>
    %38 = vector.shape_cast %37 : vector<1x32x32xf32> to vector<32x32xf32>
    %39 = vector.shape_cast %36 : vector<32x32xf32> to vector<1x32x32xf32>
    tpu.vector_store %arg9[%c2_32, %c0_33, %c0_34], %39 {strides = array<i32>} : memref<8x32x32xf32, #tpu.memory_space<vmem>>, vector<1x32x32xf32>,
    %cst_35 = arith.constant dense<0.000000e+00> : vector<32x32xf32>
    %40 = tpu.matmul %0, %36, %cst_35 {dimension_numbers = #tpu.dot_dimension_numbers<[1], [0], [0], [1], [0, 0, 1, 1], [], []>} : vector<32x32xf32>, vector<32x32xf32>, vector<32x32xf32> -> vector<32x32xf32>
    %c3 = arith.constant 3 : index
    %c0_36 = arith.constant 0 : index
    %c0_37 = arith.constant 0 : index
    %41 = vector.load %arg10[%c3, %c0_36, %c0_37] : memref<8x32x32xf32, #tpu.memory_space<vmem>>, vector<1x32x32xf32>
    %42 = vector.shape_cast %41 : vector<1x32x32xf32> to vector<32x32xf32>
    %43 = arith.addf %40, %42 : vector<32x32xf32>
    %44 = math.tanh %43 : vector<32x32xf32>
    %c3_38 = arith.constant 3 : index
    %c0_39 = arith.constant 0 : index
    %c0_40 = arith.constant 0 : index
    %45 = vector.load %arg9[%c3_38, %c0_39, %c0_40] : memref<8x32x32xf32, #tpu.memory_space<vmem>>, vector<1x32x32xf32>
    %46 = vector.shape_cast %45 : vector<1x32x32xf32> to vector<32x32xf32>
    %47 = vector.shape_cast %44 : vector<32x32xf32> to vector<1x32x32xf32>
    tpu.vector_store %arg9[%c3_38, %c0_39, %c0_40], %47 {strides = array<i32>} : memref<8x32x32xf32, #tpu.memory_space<vmem>>, vector<1x32x32xf32>,
    %cst_41 = arith.constant dense<0.000000e+00> : vector<32x32xf32>
    %48 = tpu.matmul %0, %44, %cst_41 {dimension_numbers = #tpu.dot_dimension_numbers<[1], [0], [0], [1], [0, 0, 1, 1], [], []>} : vector<32x32xf32>, vector<32x32xf32>, vector<32x32xf32> -> vector<32x32xf32>
    %c4 = arith.constant 4 : index
    %c0_42 = arith.constant 0 : index
    %c0_43 = arith.constant 0 : index
    %49 = vector.load %arg10[%c4, %c0_42, %c0_43] : memref<8x32x32xf32, #tpu.memory_space<vmem>>, vector<1x32x32xf32>
    %50 = vector.shape_cast %49 : vector<1x32x32xf32> to vector<32x32xf32>
    %51 = arith.addf %48, %50 : vector<32x32xf32>
    %52 = math.tanh %51 : vector<32x32xf32>
    %c4_44 = arith.constant 4 : index
    %c0_45 = arith.constant 0 : index
    %c0_46 = arith.constant 0 : index
    %53 = vector.load %arg9[%c4_44, %c0_45, %c0_46] : memref<8x32x32xf32, #tpu.memory_space<vmem>>, vector<1x32x32xf32>
    %54 = vector.shape_cast %53 : vector<1x32x32xf32> to vector<32x32xf32>
    %55 = vector.shape_cast %52 : vector<32x32xf32> to vector<1x32x32xf32>
    tpu.vector_store %arg9[%c4_44, %c0_45, %c0_46], %55 {strides = array<i32>} : memref<8x32x32xf32, #tpu.memory_space<vmem>>, vector<1x32x32xf32>,
    %cst_47 = arith.constant dense<0.000000e+00> : vector<32x32xf32>
    %56 = tpu.matmul %0, %52, %cst_47 {dimension_numbers = #tpu.dot_dimension_numbers<[1], [0], [0], [1], [0, 0, 1, 1], [], []>} : vector<32x32xf32>, vector<32x32xf32>, vector<32x32xf32> -> vector<32x32xf32>
    %c5 = arith.constant 5 : index
    %c0_48 = arith.constant 0 : index
    %c0_49 = arith.constant 0 : index
    %57 = vector.load %arg10[%c5, %c0_48, %c0_49] : memref<8x32x32xf32, #tpu.memory_space<vmem>>, vector<1x32x32xf32>
    %58 = vector.shape_cast %57 : vector<1x32x32xf32> to vector<32x32xf32>
    %59 = arith.addf %56, %58 : vector<32x32xf32>
    %60 = math.tanh %59 : vector<32x32xf32>
    %c5_50 = arith.constant 5 : index
    %c0_51 = arith.constant 0 : index
    %c0_52 = arith.constant 0 : index
    %61 = vector.load %arg9[%c5_50, %c0_51, %c0_52] : memref<8x32x32xf32, #tpu.memory_space<vmem>>, vector<1x32x32xf32>
    %62 = vector.shape_cast %61 : vector<1x32x32xf32> to vector<32x32xf32>
    %63 = vector.shape_cast %60 : vector<32x32xf32> to vector<1x32x32xf32>
    tpu.vector_store %arg9[%c5_50, %c0_51, %c0_52], %63 {strides = array<i32>} : memref<8x32x32xf32, #tpu.memory_space<vmem>>, vector<1x32x32xf32>,
    %cst_53 = arith.constant dense<0.000000e+00> : vector<32x32xf32>
    %64 = tpu.matmul %0, %60, %cst_53 {dimension_numbers = #tpu.dot_dimension_numbers<[1], [0], [0], [1], [0, 0, 1, 1], [], []>} : vector<32x32xf32>, vector<32x32xf32>, vector<32x32xf32> -> vector<32x32xf32>
    %c6 = arith.constant 6 : index
    %c0_54 = arith.constant 0 : index
    %c0_55 = arith.constant 0 : index
    %65 = vector.load %arg10[%c6, %c0_54, %c0_55] : memref<8x32x32xf32, #tpu.memory_space<vmem>>, vector<1x32x32xf32>
    %66 = vector.shape_cast %65 : vector<1x32x32xf32> to vector<32x32xf32>
    %67 = arith.addf %64, %66 : vector<32x32xf32>
    %68 = math.tanh %67 : vector<32x32xf32>
    %c6_56 = arith.constant 6 : index
    %c0_57 = arith.constant 0 : index
    %c0_58 = arith.constant 0 : index
    %69 = vector.load %arg9[%c6_56, %c0_57, %c0_58] : memref<8x32x32xf32, #tpu.memory_space<vmem>>, vector<1x32x32xf32>
    %70 = vector.shape_cast %69 : vector<1x32x32xf32> to vector<32x32xf32>
    %71 = vector.shape_cast %68 : vector<32x32xf32> to vector<1x32x32xf32>
    tpu.vector_store %arg9[%c6_56, %c0_57, %c0_58], %71 {strides = array<i32>} : memref<8x32x32xf32, #tpu.memory_space<vmem>>, vector<1x32x32xf32>,
    %cst_59 = arith.constant dense<0.000000e+00> : vector<32x32xf32>
    %72 = tpu.matmul %0, %68, %cst_59 {dimension_numbers = #tpu.dot_dimension_numbers<[1], [0], [0], [1], [0, 0, 1, 1], [], []>} : vector<32x32xf32>, vector<32x32xf32>, vector<32x32xf32> -> vector<32x32xf32>
    %c7 = arith.constant 7 : index
    %c0_60 = arith.constant 0 : index
    %c0_61 = arith.constant 0 : index
    %73 = vector.load %arg10[%c7, %c0_60, %c0_61] : memref<8x32x32xf32, #tpu.memory_space<vmem>>, vector<1x32x32xf32>
    %74 = vector.shape_cast %73 : vector<1x32x32xf32> to vector<32x32xf32>
    %75 = arith.addf %72, %74 : vector<32x32xf32>
    %76 = math.tanh %75 : vector<32x32xf32>
    %c7_62 = arith.constant 7 : index
    %c0_63 = arith.constant 0 : index
    %c0_64 = arith.constant 0 : index
    %77 = vector.load %arg9[%c7_62, %c0_63, %c0_64] : memref<8x32x32xf32, #tpu.memory_space<vmem>>, vector<1x32x32xf32>
    %78 = vector.shape_cast %77 : vector<1x32x32xf32> to vector<32x32xf32>
    %79 = vector.shape_cast %76 : vector<32x32xf32> to vector<1x32x32xf32>
    tpu.vector_store %arg9[%c7_62, %c0_63, %c0_64], %79 {strides = array<i32>} : memref<8x32x32xf32, #tpu.memory_space<vmem>>, vector<1x32x32xf32>,
    %c0_65 = arith.constant 0 : index
    %c0_66 = arith.constant 0 : index
    %80 = vector.load %arg8[%c0_65, %c0_66] : memref<32x32xf32, #tpu.memory_space<vmem>>, vector<32x32xf32>
    tpu.vector_store %arg8[%c0_65, %c0_66], %76 {strides = array<i32>} : memref<32x32xf32, #tpu.memory_space<vmem>>, vector<32x32xf32>,
    %c0_67 = arith.constant 0 : index
    %c0_68 = arith.constant 0 : index
    %c0_69 = arith.constant 0 : index
    %81 = vector.load %arg9[%c0_67, %c0_68, %c0_69] : memref<8x32x32xf32, #tpu.memory_space<vmem>>, vector<1x32x32xf32>
    %82 = vector.shape_cast %81 : vector<1x32x32xf32> to vector<32x32xf32>
    %cst_70 = arith.constant dense<0.000000e+00> : vector<32x32xf32>
    %83 = tpu.matmul %1, %82, %cst_70 {dimension_numbers = #tpu.dot_dimension_numbers<[1], [0], [0], [1], [0, 0, 1, 1], [], []>} : vector<32x32xf32>, vector<32x32xf32>, vector<32x32xf32> -> vector<32x32xf32>
    %84 = arith.addf %83, %14 : vector<32x32xf32>
    %c0_71 = arith.constant 0 : index
    %c0_72 = arith.constant 0 : index
    %c0_73 = arith.constant 0 : index
    %85 = vector.load %arg7[%c0_71, %c0_72, %c0_73] : memref<8x32x32xf32, #tpu.memory_space<vmem>>, vector<1x32x32xf32>
    %86 = vector.shape_cast %85 : vector<1x32x32xf32> to vector<32x32xf32>
    %87 = vector.shape_cast %84 : vector<32x32xf32> to vector<1x32x32xf32>
    tpu.vector_store %arg7[%c0_71, %c0_72, %c0_73], %87 {strides = array<i32>} : memref<8x32x32xf32, #tpu.memory_space<vmem>>, vector<1x32x32xf32>,
    %c1_74 = arith.constant 1 : index
    %c0_75 = arith.constant 0 : index
    %c0_76 = arith.constant 0 : index
    %88 = vector.load %arg9[%c1_74, %c0_75, %c0_76] : memref<8x32x32xf32, #tpu.memory_space<vmem>>, vector<1x32x32xf32>
    %89 = vector.shape_cast %88 : vector<1x32x32xf32> to vector<32x32xf32>
    %cst_77 = arith.constant dense<0.000000e+00> : vector<32x32xf32>
    %90 = tpu.matmul %1, %89, %cst_77 {dimension_numbers = #tpu.dot_dimension_numbers<[1], [0], [0], [1], [0, 0, 1, 1], [], []>} : vector<32x32xf32>, vector<32x32xf32>, vector<32x32xf32> -> vector<32x32xf32>
    %91 = arith.addf %90, %14 : vector<32x32xf32>
    %c1_78 = arith.constant 1 : index
    %c0_79 = arith.constant 0 : index
    %c0_80 = arith.constant 0 : index
    %92 = vector.load %arg7[%c1_78, %c0_79, %c0_80] : memref<8x32x32xf32, #tpu.memory_space<vmem>>, vector<1x32x32xf32>
    %93 = vector.shape_cast %92 : vector<1x32x32xf32> to vector<32x32xf32>
    %94 = vector.shape_cast %91 : vector<32x32xf32> to vector<1x32x32xf32>
    tpu.vector_store %arg7[%c1_78, %c0_79, %c0_80], %94 {strides = array<i32>} : memref<8x32x32xf32, #tpu.memory_space<vmem>>, vector<1x32x32xf32>,
    %c2_81 = arith.constant 2 : index
    %c0_82 = arith.constant 0 : index
    %c0_83 = arith.constant 0 : index
    %95 = vector.load %arg9[%c2_81, %c0_82, %c0_83] : memref<8x32x32xf32, #tpu.memory_space<vmem>>, vector<1x32x32xf32>
    %96 = vector.shape_cast %95 : vector<1x32x32xf32> to vector<32x32xf32>
    %cst_84 = arith.constant dense<0.000000e+00> : vector<32x32xf32>
    %97 = tpu.matmul %1, %96, %cst_84 {dimension_numbers = #tpu.dot_dimension_numbers<[1], [0], [0], [1], [0, 0, 1, 1], [], []>} : vector<32x32xf32>, vector<32x32xf32>, vector<32x32xf32> -> vector<32x32xf32>
    %98 = arith.addf %97, %14 : vector<32x32xf32>
    %c2_85 = arith.constant 2 : index
    %c0_86 = arith.constant 0 : index
    %c0_87 = arith.constant 0 : index
    %99 = vector.load %arg7[%c2_85, %c0_86, %c0_87] : memref<8x32x32xf32, #tpu.memory_space<vmem>>, vector<1x32x32xf32>
    %100 = vector.shape_cast %99 : vector<1x32x32xf32> to vector<32x32xf32>
    %101 = vector.shape_cast %98 : vector<32x32xf32> to vector<1x32x32xf32>
    tpu.vector_store %arg7[%c2_85, %c0_86, %c0_87], %101 {strides = array<i32>} : memref<8x32x32xf32, #tpu.memory_space<vmem>>, vector<1x32x32xf32>,
    %c3_88 = arith.constant 3 : index
    %c0_89 = arith.constant 0 : index
    %c0_90 = arith.constant 0 : index
    %102 = vector.load %arg9[%c3_88, %c0_89, %c0_90] : memref<8x32x32xf32, #tpu.memory_space<vmem>>, vector<1x32x32xf32>
    %103 = vector.shape_cast %102 : vector<1x32x32xf32> to vector<32x32xf32>
    %cst_91 = arith.constant dense<0.000000e+00> : vector<32x32xf32>
    %104 = tpu.matmul %1, %103, %cst_91 {dimension_numbers = #tpu.dot_dimension_numbers<[1], [0], [0], [1], [0, 0, 1, 1], [], []>} : vector<32x32xf32>, vector<32x32xf32>, vector<32x32xf32> -> vector<32x32xf32>
    %105 = arith.addf %104, %14 : vector<32x32xf32>
    %c3_92 = arith.constant 3 : index
    %c0_93 = arith.constant 0 : index
    %c0_94 = arith.constant 0 : index
    %106 = vector.load %arg7[%c3_92, %c0_93, %c0_94] : memref<8x32x32xf32, #tpu.memory_space<vmem>>, vector<1x32x32xf32>
    %107 = vector.shape_cast %106 : vector<1x32x32xf32> to vector<32x32xf32>
    %108 = vector.shape_cast %105 : vector<32x32xf32> to vector<1x32x32xf32>
    tpu.vector_store %arg7[%c3_92, %c0_93, %c0_94], %108 {strides = array<i32>} : memref<8x32x32xf32, #tpu.memory_space<vmem>>, vector<1x32x32xf32>,
    %c4_95 = arith.constant 4 : index
    %c0_96 = arith.constant 0 : index
    %c0_97 = arith.constant 0 : index
    %109 = vector.load %arg9[%c4_95, %c0_96, %c0_97] : memref<8x32x32xf32, #tpu.memory_space<vmem>>, vector<1x32x32xf32>
    %110 = vector.shape_cast %109 : vector<1x32x32xf32> to vector<32x32xf32>
    %cst_98 = arith.constant dense<0.000000e+00> : vector<32x32xf32>
    %111 = tpu.matmul %1, %110, %cst_98 {dimension_numbers = #tpu.dot_dimension_numbers<[1], [0], [0], [1], [0, 0, 1, 1], [], []>} : vector<32x32xf32>, vector<32x32xf32>, vector<32x32xf32> -> vector<32x32xf32>
    %112 = arith.addf %111, %14 : vector<32x32xf32>
    %c4_99 = arith.constant 4 : index
    %c0_100 = arith.constant 0 : index
    %c0_101 = arith.constant 0 : index
    %113 = vector.load %arg7[%c4_99, %c0_100, %c0_101] : memref<8x32x32xf32, #tpu.memory_space<vmem>>, vector<1x32x32xf32>
    %114 = vector.shape_cast %113 : vector<1x32x32xf32> to vector<32x32xf32>
    %115 = vector.shape_cast %112 : vector<32x32xf32> to vector<1x32x32xf32>
    tpu.vector_store %arg7[%c4_99, %c0_100, %c0_101], %115 {strides = array<i32>} : memref<8x32x32xf32, #tpu.memory_space<vmem>>, vector<1x32x32xf32>,
    %c5_102 = arith.constant 5 : index
    %c0_103 = arith.constant 0 : index
    %c0_104 = arith.constant 0 : index
    %116 = vector.load %arg9[%c5_102, %c0_103, %c0_104] : memref<8x32x32xf32, #tpu.memory_space<vmem>>, vector<1x32x32xf32>
    %117 = vector.shape_cast %116 : vector<1x32x32xf32> to vector<32x32xf32>
    %cst_105 = arith.constant dense<0.000000e+00> : vector<32x32xf32>
    %118 = tpu.matmul %1, %117, %cst_105 {dimension_numbers = #tpu.dot_dimension_numbers<[1], [0], [0], [1], [0, 0, 1, 1], [], []>} : vector<32x32xf32>, vector<32x32xf32>, vector<32x32xf32> -> vector<32x32xf32>
    %119 = arith.addf %118, %14 : vector<32x32xf32>
    %c5_106 = arith.constant 5 : index
    %c0_107 = arith.constant 0 : index
    %c0_108 = arith.constant 0 : index
    %120 = vector.load %arg7[%c5_106, %c0_107, %c0_108] : memref<8x32x32xf32, #tpu.memory_space<vmem>>, vector<1x32x32xf32>
    %121 = vector.shape_cast %120 : vector<1x32x32xf32> to vector<32x32xf32>
    %122 = vector.shape_cast %119 : vector<32x32xf32> to vector<1x32x32xf32>
    tpu.vector_store %arg7[%c5_106, %c0_107, %c0_108], %122 {strides = array<i32>} : memref<8x32x32xf32, #tpu.memory_space<vmem>>, vector<1x32x32xf32>,
    %c6_109 = arith.constant 6 : index
    %c0_110 = arith.constant 0 : index
    %c0_111 = arith.constant 0 : index
    %123 = vector.load %arg9[%c6_109, %c0_110, %c0_111] : memref<8x32x32xf32, #tpu.memory_space<vmem>>, vector<1x32x32xf32>
    %124 = vector.shape_cast %123 : vector<1x32x32xf32> to vector<32x32xf32>
    %cst_112 = arith.constant dense<0.000000e+00> : vector<32x32xf32>
    %125 = tpu.matmul %1, %124, %cst_112 {dimension_numbers = #tpu.dot_dimension_numbers<[1], [0], [0], [1], [0, 0, 1, 1], [], []>} : vector<32x32xf32>, vector<32x32xf32>, vector<32x32xf32> -> vector<32x32xf32>
    %126 = arith.addf %125, %14 : vector<32x32xf32>
    %c6_113 = arith.constant 6 : index
    %c0_114 = arith.constant 0 : index
    %c0_115 = arith.constant 0 : index
    %127 = vector.load %arg7[%c6_113, %c0_114, %c0_115] : memref<8x32x32xf32, #tpu.memory_space<vmem>>, vector<1x32x32xf32>
    %128 = vector.shape_cast %127 : vector<1x32x32xf32> to vector<32x32xf32>
    %129 = vector.shape_cast %126 : vector<32x32xf32> to vector<1x32x32xf32>
    tpu.vector_store %arg7[%c6_113, %c0_114, %c0_115], %129 {strides = array<i32>} : memref<8x32x32xf32, #tpu.memory_space<vmem>>, vector<1x32x32xf32>,
    %c7_116 = arith.constant 7 : index
    %c0_117 = arith.constant 0 : index
    %c0_118 = arith.constant 0 : index
    %130 = vector.load %arg9[%c7_116, %c0_117, %c0_118] : memref<8x32x32xf32, #tpu.memory_space<vmem>>, vector<1x32x32xf32>
    %131 = vector.shape_cast %130 : vector<1x32x32xf32> to vector<32x32xf32>
    %cst_119 = arith.constant dense<0.000000e+00> : vector<32x32xf32>
    %132 = tpu.matmul %1, %131, %cst_119 {dimension_numbers = #tpu.dot_dimension_numbers<[1], [0], [0], [1], [0, 0, 1, 1], [], []>} : vector<32x32xf32>, vector<32x32xf32>, vector<32x32xf32> -> vector<32x32xf32>
    %133 = arith.addf %132, %14 : vector<32x32xf32>
    %c7_120 = arith.constant 7 : index
    %c0_121 = arith.constant 0 : index
    %c0_122 = arith.constant 0 : index
    %134 = vector.load %arg7[%c7_120, %c0_121, %c0_122] : memref<8x32x32xf32, #tpu.memory_space<vmem>>, vector<1x32x32xf32>
    %135 = vector.shape_cast %134 : vector<1x32x32xf32> to vector<32x32xf32>
    %136 = vector.shape_cast %133 : vector<32x32xf32> to vector<1x32x32xf32>
    tpu.vector_store %arg7[%c7_120, %c0_121, %c0_122], %136 {strides = array<i32>} : memref<8x32x32xf32, #tpu.memory_space<vmem>>, vector<1x32x32xf32>,
    return
  }
}

</mosaic_0001>

<bundles_post_ra>
// kernel: tpu_custom_call.1
= control target key start
LH: loop header
LB: loop body
LE: loop exit
PB: predicated region body
PF: predicated region fallthrough
CT: control target
= control target key end

     0   :  { %14 = vsyncpa [#allocation5], 0  ;;  %s1737_s0 = inlined_call_operand.hbm [shape: f32[8,32], index: 0, kind: input, shape index: {}]   ;;  %s1738_s1 = inlined_call_operand.vmem [shape: f32[32,32], index: 1, kind: input, shape index: {}]   ;;  %s1739_s2 = inlined_call_operand.vmem [shape: f32[32,32], index: 2, kind: input, shape index: {}]   ;;  %s1740_s3 = inlined_call_operand.hbm [shape: f32[32,32], index: 3, kind: input, shape index: {}]   ;;  %s1741_s4 = inlined_call_operand.vmem [shape: f32[32,1], index: 4, kind: input, shape index: {}]   ;;  %s1742_s5 = inlined_call_operand.hbm [shape: f32[32,32], index: 5, kind: input, shape index: {}]   ;;  %s1743_s6 = inlined_call_operand.vmem [shape: f32[32,1], index: 6, kind: input, shape index: {}]   ;;  %s1744_s7 = inlined_call_operand.hbm [shape: f32[8,32,32], index: 7, kind: output, shape index: {0}]   ;;  %s1745_s8 = inlined_call_operand.hbm [shape: f32[32,32], index: 8, kind: output, shape index: {1}]  }
   0x1   :  { %15 = vsyncpa [#allocation8], 0 }
   0x2   :  { %16 = vsyncpa [#allocation6], 0  ;;  %s37_s29 = sshll.u32 %s1740_s3, 4  ;;  %s38_s29 = int_to_ptr.hbm [resolvable:$true] %s37_s29 }
   0x3   :  { %17 = vsyncpa [#allocation12], 0  ;;  %s1251_s30 = smov [#allocation7]   ;;  %s23_s12 = sshll.u32 %s1737_s0, 4  ;;  %s24_s12 = int_to_ptr.hbm [resolvable:$true] %s23_s12 }
   0x4   :  { %s39_s9 = sshll.u32 %s1251_s30, 4  ;;  %s1252_s13 = smov 128   ;;  %s40_s9 = int_to_ptr.vmem [resolvable:$true] %s39_s9 }
   0x5   :  { %s1253_s14 = smov 8   ;;  %s1254_s15 = smov [#allocation4]  }
   0x6   :  { %45 = dma.hbm_to_vmem [thread:$0]  %s38_s29, 512, %s40_s9, [#allocation8], %s1252_s13, %s1252_s13, %s1253_s14  }
   0x7   :  { %s25_s16 = sshll.u32 %s1254_s15, 4  ;;  %s52_s18 = sshll.u32 %s1742_s5, 4  ;;  %s26_s16 = int_to_ptr.vmem [resolvable:$true] %s25_s16  ;;  %s53_s18 = int_to_ptr.hbm [resolvable:$true] %s52_s18 }
   0x8   :  { %28 = dma.hbm_to_vmem [thread:$0]  %s24_s12, 128, %s26_s16, [#allocation5]  }
   0x9   :  { %s1255_s19 = smov [#allocation9]  }
   0xa   :  { %s54_s20 = sshll.u32 %s1255_s19, 4  ;;  %s55_s20 = int_to_ptr.vmem [resolvable:$true] %s54_s20 }
   0xb   :  { %60 = dma.hbm_to_vmem [thread:$0]  %s53_s18, 512, %s55_s20, [#allocation8], %s1252_s13, %s1252_s13, %s1253_s14  }
   0xc   :  { %1243 = dma.done.wait [#allocation5], 128  }
   0xd   :  { %1244 = vsyncadd [#allocation5], 4294967168 }
   0xe   :  { %1245 = dma.done.wait [#allocation8], 1024  }
   0xf   :  { %1246 = vsyncadd [#allocation8], 4294966272  ;;  %v1256_v0 = vmov 0   ;;  %vm88_vm0 = vcmask 261120   ;;  %v87_v1 = vld [vmem:[%s1739_s2 + $0x18] sm:$0xff]  ;;  %v262_v3 = vld [vmem:[%s1738_s1 + $0x10] sm:$0xff] }
  0x10   :  { %1056 = vset.pattern.permute.xlu0 %v1256_v0  ;;  %1057 = vset.pattern.permute.xlu1 %v1256_v0  ;;  %v263_v2 = vld [vmem:[%s1738_s1 + $0x18] sm:$0xff]  ;;  %v86_v4 = vld [vmem:[%s1739_s2 + $0x10] sm:$0xff]  ;;  %v261_v5 = vld [vmem:[%s1738_s1 + $0x8] sm:$0xff]  ;;  %s956_s28 = sshll.u32 %s1745_s8, 4  ;;  %s1258_s8 = smov [#allocation10]   ;;  %s957_s28 = int_to_ptr.hbm [resolvable:$true] %s956_s28 }
  0x11   :  { %1058 = vset.pattern.permute.xlu2 %v1256_v0  ;;  %975 = vmatpush.xpose.msk.msra.mxu0 %vm88_vm0, %v87_v1  ;;  %v135_v6 = vld [vmem:[%s1741_s4 + $0x18] sm:$0xff]  ;;  %v133_v7 = vld [vmem:[%s1741_s4 + $0x8] sm:$0xff]  ;;  %v260_v8 = vld [vmem:[%s1738_s1] sm:$0xff]  ;;  %s941_s29 = sshll.u32 %s1258_s8, 4  ;;  %s943_s10 = sshll.u32 %s1744_s7, 4  ;;  %s942_s29 = int_to_ptr.vmem [resolvable:$true] %s941_s29  ;;  %s944_s10 = int_to_ptr.hbm [resolvable:$true] %s943_s10 }
  0x12   :  { %292 = vmatpush.msra.mxu1 %v263_v2  ;;  %169 = vperm.xlu0 %1056, %v135_v6   ;;  %v1345_v9 = vld [vmem:[#allocation7] sm:$0xff]  ;;  %v134_v11 = vld [vmem:[%s1741_s4 + $0x10] sm:$0xff]  ;;  %v132_v12 = vld [vmem:[%s1741_s4] sm:$0xff] }
  0x13   :  { %159 = vperm.xlu1 %1057, %v133_v7   ;;  %v85_v10 = vld [vmem:[%s1739_s2 + $0x8] sm:$0xff]  ;;  %v84_v13 = vld [vmem:[%s1739_s2] sm:$0xff]  ;;  %v1363_v15 = vld [vmem:[#allocation7 + $0x8] sm:$0xff] }
  0x14   :  { %293 = vmatpush.msra.mxu1 %v262_v3  ;;  %v83_v14 = vld [vmem:[#allocation4] sm:$0xff]  ;;  %v238_v16 = vld [vmem:[%s1743_s6 + $0x10] sm:$0xff]  ;;  %v239_v17 = vld [vmem:[%s1743_s6 + $0x18] sm:$0xff] }
  0x15   :  { %976 = vmatpush.xpose.msk.msra.mxu0 %vm88_vm0, %v86_v4  ;;  %v1374_v18 = vld [vmem:[#allocation7 + $0x10] sm:$0xff]  ;;  %v1378_v19 = vld [vmem:[#allocation7 + $0x18] sm:$0xff] }
  0x16   :  { %294 = vmatpush.msra.mxu1 %v261_v5 }
  0x18   :  { %295 = vmatpush.msra.mxu1 %v260_v8 }
  0x19   :  { %980 = vmatmul.msk.f32.vlgmr.msra.gmra.mxu1 %vm88_vm0, %v1345_v9  ;;  %977 = vmatpush.xpose.msk.msra.mxu0 %vm88_vm0, %v85_v10 }
  0x1a   :  { %164 = vperm.xlu0 %1056, %v134_v11  }
  0x1b   :  { %154 = vperm.xlu1 %1057, %v132_v12  }
  0x1d   :  { %978 = vmatpush.xpose.msk.msra.mxu0 %vm88_vm0, %v84_v13 }
  0x20   :  { %979 = vmatmul.msk.f32.vlgmr.msra.gmra.mxu0 %vm88_vm0, %v83_v14 }
  0x21   :  { %981 = vmatmul.msk.f32.gmra.mxu1 %vm88_vm0, %v1363_v15 }
  0x22   :  { %252 = vperm.xlu0 %1056, %v238_v16  }
  0x23   :  { %257 = vperm.xlu1 %1057, %v239_v17  }
  0x29   :  { %982 = vmatmul.msk.f32.gmra.mxu1 %vm88_vm0, %v1374_v18 }
  0x31   :  { %983 = vmatmul.msk.f32.gmra.mxu1 %vm88_vm0, %v1378_v19 }
  0x84   :  { %v1386_v22 = vpop.permute.xlu0 %169 }
  0x85   :  { %v1384_v21 = vpop.permute.xlu1 %159 }
  0x8c   :  { %v1395_v30 = vpop.permute.xlu0 %164 }
  0x8d   :  { %v1393_v28 = vpop.permute.xlu1 %154 }
  0x96   :  { %v1382_v20 = vpop.f32.mrf.mxu1 }
  0x9d   :  { %v1388_v23 = vpop.f32.mrf.mxu0 }
  0x9e   :  { %v300_v24 = vpop.f32.mrf.mxu1  ;;  %v125_v25 = vrot.slane %v1388_v23, 1  ;;  %v126_v26 = vrot.slane %v1388_v23, 2  ;;  %v136_v27 = vperm.slane %v1388_v23, 0  ;;  %v127_v35 = vrot.slane %v1388_v23, 3 }
  0x9f   :  { %v128_v42 = vrot.slane %v1388_v23, 4  ;;  %v129_v48 = vrot.slane %v1388_v23, 5  ;;  %v130_v60 = vrot.slane %v1388_v23, 6  ;;  %v131_v5 = vrot.slane %v1388_v23, 7 }
  0xa0   :  { %v137_v29 = vperm.slane %v125_v25, 0  ;;  %v172_v31 = vadd.f32 %v1393_v28, %v136_v27  ;;  %v173_v32 = vadd.f32 %v1384_v21, %v136_v27  ;;  %v174_v33 = vadd.f32 %v1395_v30, %v136_v27 }
  0xa1   :  { %v175_v34 = vadd.f32 %v1386_v22, %v136_v27  ;;  %v138_v36 = vperm.slane %v126_v26, 0  ;;  %v139_v43 = vperm.slane %v127_v35, 0  ;;  %v140_v49 = vperm.slane %v128_v42, 0 }
  0xa2   :  { %v176_v37 = vadd.f32 %v1393_v28, %v137_v29  ;;  %204 = vst.msk [vmem:[#allocation3] sm:$0xff] %vm88_vm0, %v172_v31  ;;  %v177_v38 = vadd.f32 %v1384_v21, %v137_v29  ;;  %v178_v39 = vadd.f32 %v1395_v30, %v137_v29  ;;  %v179_v41 = vadd.f32 %v1386_v22, %v137_v29 }
  0xa3   :  { %205 = vst.msk [vmem:[#allocation3 + $0x8] sm:$0xff] %vm88_vm0, %v173_v32  ;;  %v180_v44 = vadd.f32 %v1393_v28, %v138_v36  ;;  %v181_v45 = vadd.f32 %v1384_v21, %v138_v36  ;;  %v182_v46 = vadd.f32 %v1395_v30, %v138_v36  ;;  %v183_v47 = vadd.f32 %v1386_v22, %v138_v36 }
  0xa4   :  { %206 = vst.msk [vmem:[#allocation3 + $0x10] sm:$0xff] %vm88_vm0, %v174_v33  ;;  %v184_v50 = vadd.f32 %v1393_v28, %v139_v43  ;;  %v185_v51 = vadd.f32 %v1384_v21, %v139_v43  ;;  %v186_v53 = vadd.f32 %v1395_v30, %v139_v43  ;;  %v187_v57 = vadd.f32 %v1386_v22, %v139_v43 }
  0xa5   :  { %207 = vst.msk [vmem:[#allocation3 + $0x18] sm:$0xff] %vm88_vm0, %v175_v34  ;;  %v141_v61 = vperm.slane %v129_v48, 0  ;;  %v188_v62 = vadd.f32 %v1393_v28, %v140_v49  ;;  %v189_v0 = vadd.f32 %v1384_v21, %v140_v49  ;;  %v190_v2 = vadd.f32 %v1395_v30, %v140_v49 }
  0xa6   :  { %v303_v40 = vpop.f32.mrf.mxu1  ;;  %208 = vst.msk [vmem:[#allocation3 + $0x20] sm:$0xff] %vm88_vm0, %v176_v37  ;;  %v191_v3 = vadd.f32 %v1386_v22, %v140_v49  ;;  %v142_v6 = vperm.slane %v130_v60, 0  ;;  %v143_v13 = vperm.slane %v131_v5, 0 }
  0xa7   :  { %209 = vst.msk [vmem:[#allocation3 + $0x28] sm:$0xff] %vm88_vm0, %v177_v38  ;;  %v192_v7 = vadd.f32 %v1393_v28, %v141_v61  ;;  %v193_v8 = vadd.f32 %v1384_v21, %v141_v61  ;;  %v194_v10 = vadd.f32 %v1395_v30, %v141_v61  ;;  %v195_v12 = vadd.f32 %v1386_v22, %v141_v61 }
  0xa8   :  { %210 = vst.msk [vmem:[#allocation3 + $0x30] sm:$0xff] %vm88_vm0, %v178_v39  ;;  %v196_v14 = vadd.f32 %v1393_v28, %v142_v6  ;;  %v197_v17 = vadd.f32 %v1384_v21, %v142_v6  ;;  %v200_v25 = vadd.f32 %v1393_v28, %v143_v13  ;;  %v201_v27 = vadd.f32 %v1384_v21, %v143_v13 }
  0xa9   :  { %211 = vst.msk [vmem:[#allocation3 + $0x38] sm:$0xff] %vm88_vm0, %v179_v41  ;;  %v264_v63 = vld [vmem:[#allocation3] sm:$0xff]  ;;  %v202_v29 = vadd.f32 %v1395_v30, %v143_v13  ;;  %v203_v31 = vadd.f32 %v1386_v22, %v143_v13 }
  0xaa   :  { %212 = vst.msk [vmem:[#allocation3 + $0x40] sm:$0xff] %vm88_vm0, %v180_v44  ;;  %v265_v54 = vld [vmem:[#allocation3 + $0x8] sm:$0xff]  ;;  %v298_v4 = vadd.f32 %v1382_v20, %v264_v63  ;;  %v198_v20 = vadd.f32 %v1395_v30, %v142_v6 }
  0xab   :  { %213 = vst.msk [vmem:[#allocation3 + $0x48] sm:$0xff] %vm88_vm0, %v181_v45  ;;  %v266_v52 = vld [vmem:[#allocation3 + $0x10] sm:$0xff]  ;;  %v301_v1 = vadd.f32 %v300_v24, %v265_v54  ;;  %v199_v24 = vadd.f32 %v1386_v22, %v142_v6 }
  0xac   :  { %214 = vst.msk [vmem:[#allocation3 + $0x50] sm:$0xff] %vm88_vm0, %v182_v46  ;;  %v267_v55 = vld [vmem:[#allocation3 + $0x18] sm:$0xff]  ;;  %v304_v58 = vadd.f32 %v303_v40, %v266_v52 }
  0xad   :  { %215 = vst.msk [vmem:[#allocation3 + $0x58] sm:$0xff] %vm88_vm0, %v183_v47  ;;  %v318_v21 = vld [vmem:[#allocation3 + $0x20] sm:$0xff] }
  0xae   :  { %v306_v56 = vpop.f32.mrf.mxu1  ;;  %216 = vst.msk [vmem:[#allocation3 + $0x60] sm:$0xff] %vm88_vm0, %v184_v50  ;;  %v319_v30 = vld [vmem:[#allocation3 + $0x28] sm:$0xff] }
  0xaf   :  { %v307_v59 = vadd.f32 %v306_v56, %v267_v55  ;;  %217 = vst.msk [vmem:[#allocation3 + $0x68] sm:$0xff] %vm88_vm0, %v185_v51  ;;  %v320_v35 = vld [vmem:[#allocation3 + $0x30] sm:$0xff] }
  0xb0   :  { %218 = vst.msk [vmem:[#allocation3 + $0x70] sm:$0xff] %vm88_vm0, %v186_v53  ;;  %v321_v39 = vld [vmem:[#allocation3 + $0x38] sm:$0xff] }
  0xb1   :  { %1059 = vtanh.f32 %v307_v59  ;;  %219 = vst.msk [vmem:[#allocation3 + $0x78] sm:$0xff] %vm88_vm0, %v187_v57  ;;  %v361_v44 = vld [vmem:[#allocation3 + $0x40] sm:$0xff] }
  0xb2   :  { %1061 = vtanh.f32 %v304_v58  ;;  %220 = vst.msk [vmem:[#allocation3 + $0x80] sm:$0xff] %vm88_vm0, %v188_v62  ;;  %v362_v47 = vld [vmem:[#allocation3 + $0x48] sm:$0xff] }
  0xb3   :  { %221 = vst.msk [vmem:[#allocation3 + $0x88] sm:$0xff] %vm88_vm0, %v189_v0  ;;  %1063 = vtanh.f32 %v301_v1  ;;  %v363_v51 = vld [vmem:[#allocation3 + $0x50] sm:$0xff] }
  0xb4   :  { %222 = vst.msk [vmem:[#allocation3 + $0x90] sm:$0xff] %vm88_vm0, %v190_v2  ;;  %1065 = vtanh.f32 %v298_v4  ;;  %v364_v55 = vld [vmem:[#allocation3 + $0x58] sm:$0xff] }
  0xb5   :  { %223 = vst.msk [vmem:[#allocation3 + $0x98] sm:$0xff] %vm88_vm0, %v191_v3  ;;  %v404_v60 = vld [vmem:[#allocation3 + $0x60] sm:$0xff] }
  0xb6   :  { %224 = vst.msk [vmem:[#allocation3 + $0xa0] sm:$0xff] %vm88_vm0, %v192_v7  ;;  %v405_v2 = vld [vmem:[#allocation3 + $0x68] sm:$0xff] }
  0xb7   :  { %v1060_v11 = vpop.eup %1059  ;;  %225 = vst.msk [vmem:[#allocation3 + $0xa8] sm:$0xff] %vm88_vm0, %v193_v8  ;;  %v406_v7 = vld [vmem:[#allocation3 + $0x70] sm:$0xff] }
  0xb8   :  { %334 = vmatpush.msra.mxu2 %v1060_v11  ;;  %v1062_v16 = vpop.eup %1061  ;;  %226 = vst.msk [vmem:[#allocation3 + $0xb0] sm:$0xff] %vm88_vm0, %v194_v10  ;;  %v407_v62 = vld [vmem:[#allocation3 + $0x78] sm:$0xff] }
  0xb9   :  { %v1064_v23 = vpop.eup %1063  ;;  %227 = vst.msk [vmem:[#allocation3 + $0xb8] sm:$0xff] %vm88_vm0, %v195_v12 }
  0xba   :  { %335 = vmatpush.msra.mxu2 %v1062_v16  ;;  %228 = vst.msk [vmem:[#allocation3 + $0xc0] sm:$0xff] %vm88_vm0, %v196_v14  ;;  %v1066_v26 = vpop.eup %1065 }
  0xbb   :  { %229 = vst.msk [vmem:[#allocation3 + $0xc8] sm:$0xff] %vm88_vm0, %v197_v17 }
  0xbc   :  { %336 = vmatpush.msra.mxu2 %v1064_v23  ;;  %230 = vst.msk [vmem:[#allocation3 + $0xd0] sm:$0xff] %vm88_vm0, %v198_v20  ;;  %v1515_v20 = vld [vmem:[#allocation9] sm:$0xff] }
  0xbd   :  { %231 = vst.msk [vmem:[#allocation3 + $0xd8] sm:$0xff] %vm88_vm0, %v199_v24  ;;  %v1523_v24 = vld [vmem:[#allocation9 + $0x10] sm:$0xff] }
  0xbe   :  { %337 = vmatpush.msra.mxu2 %v1066_v26  ;;  %232 = vst.msk [vmem:[#allocation3 + $0xe0] sm:$0xff] %vm88_vm0, %v200_v25  ;;  %v1527_v25 = vld [vmem:[#allocation9 + $0x18] sm:$0xff] }
  0xbf   :  { %984 = vmatmul.msk.f32.vlgmr.msra.gmra.mxu2 %vm88_vm0, %v1345_v9  ;;  %233 = vst.msk [vmem:[#allocation3 + $0xe8] sm:$0xff] %vm88_vm0, %v201_v27 }
  0xc0   :  { %234 = vst.msk [vmem:[#allocation3 + $0xf0] sm:$0xff] %vm88_vm0, %v202_v29 }
  0xc1   :  { %235 = vst.msk [vmem:[#allocation3 + $0xf8] sm:$0xff] %vm88_vm0, %v203_v31  ;;  %v448_v31 = vld [vmem:[#allocation3 + $0x88] sm:$0xff] }
  0xc2   :  { %314 = vst.msk [vmem:[#allocation2 + $0x8] sm:$0xff] %vm88_vm0, %v1064_v23  ;;  %v1519_v23 = vld [vmem:[#allocation9 + $0x8] sm:$0xff] }
  0xc3   :  { %315 = vst.msk [vmem:[#allocation2 + $0x10] sm:$0xff] %vm88_vm0, %v1062_v16 }
  0xc4   :  { %316 = vst.msk [vmem:[#allocation2 + $0x18] sm:$0xff] %vm88_vm0, %v1060_v11 }
  0xc5   :  { %313 = vst.msk [vmem:[#allocation2] sm:$0xff] %vm88_vm0, %v1066_v26  ;;  %v447_v26 = vld [vmem:[#allocation3 + $0x80] sm:$0xff] }
  0xc7   :  { %985 = vmatmul.msk.f32.gmra.mxu2 %vm88_vm0, %v1363_v15 }
  0xc9   :  { %v623_v16 = vld [vmem:[#allocation2 + $0x8] sm:$0xff] }
  0xca   :  { %v624_v14 = vld [vmem:[#allocation2 + $0x10] sm:$0xff] }
  0xcb   :  { %v625_v13 = vld [vmem:[#allocation2 + $0x18] sm:$0xff] }
  0xcc   :  { %v622_v17 = vld [vmem:[#allocation2] sm:$0xff] }
  0xcf   :  { %986 = vmatmul.msk.f32.gmra.mxu2 %vm88_vm0, %v1374_v18 }
  0xd7   :  { %987 = vmatmul.msk.f32.gmra.mxu2 %vm88_vm0, %v1378_v19 }
 0x142   :  { %v339_v22 = vpop.f32.mrf.mxu2 }
 0x143   :  { %v340_v28 = vadd.f32 %v339_v22, %v318_v21 }
 0x145   :  { %1067 = vtanh.f32 %v340_v28 }
 0x14a   :  { %v342_v32 = vpop.f32.mrf.mxu2 }
 0x14b   :  { %v1068_v33 = vpop.eup %1067  ;;  %v343_v34 = vadd.f32 %v342_v32, %v319_v30  ;;  %v449_v30 = vld [vmem:[#allocation3 + $0x90] sm:$0xff] }
 0x14c   :  { %356 = vst.msk [vmem:[#allocation2 + $0x20] sm:$0xff] %vm88_vm0, %v1068_v33 }
 0x14d   :  { %1069 = vtanh.f32 %v343_v34 }
 0x152   :  { %v345_v36 = vpop.f32.mrf.mxu2 }
 0x153   :  { %v1070_v37 = vpop.eup %1069  ;;  %v346_v38 = vadd.f32 %v345_v36, %v320_v35  ;;  %v450_v35 = vld [vmem:[#allocation3 + $0x98] sm:$0xff] }
 0x154   :  { %357 = vst.msk [vmem:[#allocation2 + $0x28] sm:$0xff] %vm88_vm0, %v1070_v37 }
 0x155   :  { %1071 = vtanh.f32 %v346_v38 }
 0x15a   :  { %v348_v40 = vpop.f32.mrf.mxu2 }
 0x15b   :  { %v1072_v41 = vpop.eup %1071  ;;  %v349_v42 = vadd.f32 %v348_v40, %v321_v39 }
 0x15c   :  { %358 = vst.msk [vmem:[#allocation2 + $0x30] sm:$0xff] %vm88_vm0, %v1072_v41 }
 0x15d   :  { %1073 = vtanh.f32 %v349_v42 }
 0x163   :  { %v1074_v43 = vpop.eup %1073 }
 0x164   :  { %359 = vst.msk [vmem:[#allocation2 + $0x38] sm:$0xff] %vm88_vm0, %v1074_v43  ;;  %377 = vmatpush.msra.mxu3 %v1074_v43 }
 0x166   :  { %378 = vmatpush.msra.mxu3 %v1072_v41 }
 0x168   :  { %379 = vmatpush.msra.mxu3 %v1070_v37 }
 0x16a   :  { %380 = vmatpush.msra.mxu3 %v1068_v33 }
 0x16b   :  { %988 = vmatmul.msk.f32.vlgmr.msra.gmra.mxu3 %vm88_vm0, %v1345_v9  ;;  %v674_v42 = vld [vmem:[#allocation2 + $0x38] sm:$0xff] }
 0x173   :  { %989 = vmatmul.msk.f32.gmra.mxu3 %vm88_vm0, %v1363_v15 }
 0x17b   :  { %990 = vmatmul.msk.f32.gmra.mxu3 %vm88_vm0, %v1374_v18 }
 0x183   :  { %991 = vmatmul.msk.f32.gmra.mxu3 %vm88_vm0, %v1378_v19 }
 0x1ee   :  { %v382_v45 = vpop.f32.mrf.mxu3 }
 0x1ef   :  { %v383_v46 = vadd.f32 %v382_v45, %v361_v44  ;;  %v673_v44 = vld [vmem:[#allocation2 + $0x30] sm:$0xff] }
 0x1f1   :  { %1075 = vtanh.f32 %v383_v46  ;;  %v672_v46 = vld [vmem:[#allocation2 + $0x28] sm:$0xff] }
 0x1f6   :  { %v385_v48 = vpop.f32.mrf.mxu3 }
 0x1f7   :  { %v1076_v49 = vpop.eup %1075  ;;  %v386_v50 = vadd.f32 %v385_v48, %v362_v47  ;;  %v671_v48 = vld [vmem:[#allocation2 + $0x20] sm:$0xff] }
 0x1f8   :  { %399 = vst.msk [vmem:[#allocation2 + $0x40] sm:$0xff] %vm88_vm0, %v1076_v49 }
 0x1f9   :  { %1077 = vtanh.f32 %v386_v50  ;;  %v1541_v50 = vpop.permute.xlu0 %252 }
 0x1fe   :  { %v388_v52 = vpop.f32.mrf.mxu3 }
 0x1ff   :  { %v1078_v53 = vpop.eup %1077  ;;  %v389_v54 = vadd.f32 %v388_v52, %v363_v51 }
 0x200   :  { %400 = vst.msk [vmem:[#allocation2 + $0x48] sm:$0xff] %vm88_vm0, %v1078_v53 }
 0x201   :  { %1079 = vtanh.f32 %v389_v54 }
 0x206   :  { %v391_v56 = vpop.f32.mrf.mxu3 }
 0x207   :  { %v1080_v57 = vpop.eup %1079  ;;  %v392_v58 = vadd.f32 %v391_v56, %v364_v55  ;;  %v490_v56 = vld [vmem:[#allocation3 + $0xa0] sm:$0xff] }
 0x208   :  { %401 = vst.msk [vmem:[#allocation2 + $0x50] sm:$0xff] %vm88_vm0, %v1080_v57 }
 0x209   :  { %1081 = vtanh.f32 %v392_v58 }
 0x20f   :  { %v1082_v59 = vpop.eup %1081 }
 0x210   :  { %402 = vst.msk [vmem:[#allocation2 + $0x58] sm:$0xff] %vm88_vm0, %v1082_v59  ;;  %420 = vmatpush.msrb.mxu0 %v1082_v59  ;;  %1044 = vmatpush.msrb.mxu1 %v1082_v59 }
 0x212   :  { %421 = vmatpush.msrb.mxu0 %v1080_v57  ;;  %1045 = vmatpush.msrb.mxu1 %v1080_v57 }
 0x214   :  { %422 = vmatpush.msrb.mxu0 %v1078_v53  ;;  %1046 = vmatpush.msrb.mxu1 %v1078_v53  ;;  %v1549_v53 = vpop.permute.xlu1 %257 }
 0x216   :  { %423 = vmatpush.msrb.mxu0 %v1076_v49  ;;  %1047 = vmatpush.msrb.mxu1 %v1076_v49 }
 0x217   :  { %992 = vmatmul.msk.f32.vlgmr.msrb.gmra.mxu0 %vm88_vm0, %v1345_v9  ;;  %995 = vmatmul.msk.f32.vlgmr.msrb.gmra.mxu1 %vm88_vm0, %v1378_v19 }
 0x21f   :  { %993 = vmatmul.msk.f32.gmra.mxu0 %vm88_vm0, %v1363_v15 }
 0x227   :  { %994 = vmatmul.msk.f32.gmra.mxu0 %vm88_vm0, %v1374_v18 }
 0x294   :  { %v425_v61 = vpop.f32.mrf.mxu0  ;;  %v434_v63 = vpop.f32.mrf.mxu1 }
 0x295   :  { %v426_v0 = vadd.f32 %v425_v61, %v404_v60  ;;  %v435_v1 = vadd.f32 %v434_v63, %v407_v62  ;;  %v491_v60 = vld [vmem:[#allocation3 + $0xa8] sm:$0xff] }
 0x297   :  { %1083 = vtanh.f32 %v426_v0 }
 0x298   :  { %1085 = vtanh.f32 %v435_v1  ;;  %v492_v1 = vld [vmem:[#allocation3 + $0xb0] sm:$0xff] }
 0x29c   :  { %v428_v3 = vpop.f32.mrf.mxu0 }
 0x29d   :  { %v1084_v4 = vpop.eup %1083  ;;  %v429_v5 = vadd.f32 %v428_v3, %v405_v2 }
 0x29e   :  { %v1086_v6 = vpop.eup %1085  ;;  %442 = vst.msk [vmem:[#allocation2 + $0x60] sm:$0xff] %vm88_vm0, %v1084_v4 }
 0x29f   :  { %445 = vst.msk [vmem:[#allocation2 + $0x78] sm:$0xff] %vm88_vm0, %v1086_v6  ;;  %1087 = vtanh.f32 %v429_v5  ;;  %463 = vmatpush.msra.mxu1 %v1086_v6 }
 0x2a4   :  { %v431_v8 = vpop.f32.mrf.mxu0 }
 0x2a5   :  { %v1088_v10 = vpop.eup %1087  ;;  %v432_v11 = vadd.f32 %v431_v8, %v406_v7  ;;  %v493_v7 = vld [vmem:[#allocation3 + $0xb8] sm:$0xff] }
 0x2a6   :  { %443 = vst.msk [vmem:[#allocation2 + $0x68] sm:$0xff] %vm88_vm0, %v1088_v10 }
 0x2a7   :  { %1089 = vtanh.f32 %v432_v11 }
 0x2ad   :  { %v1090_v12 = vpop.eup %1089 }
 0x2ae   :  { %444 = vst.msk [vmem:[#allocation2 + $0x70] sm:$0xff] %vm88_vm0, %v1090_v12  ;;  %464 = vmatpush.msra.mxu1 %v1090_v12 }
 0x2b0   :  { %465 = vmatpush.msra.mxu1 %v1088_v10 }
 0x2b2   :  { %466 = vmatpush.msra.mxu1 %v1084_v4 }
 0x2b3   :  { %996 = vmatmul.msk.f32.vlgmr.msra.gmra.mxu1 %vm88_vm0, %v1345_v9 }
 0x2b4   :  { %650 = vmatpush.msrb.mxu1 %v625_v13 }
 0x2b6   :  { %651 = vmatpush.msrb.mxu1 %v624_v14 }
 0x2b8   :  { %652 = vmatpush.msrb.mxu1 %v623_v16 }
 0x2ba   :  { %653 = vmatpush.msrb.mxu1 %v622_v17 }
 0x2bb   :  { %997 = vmatmul.msk.f32.gmra.mxu1 %vm88_vm0, %v1363_v15 }
 0x2c3   :  { %998 = vmatmul.msk.f32.gmra.mxu1 %vm88_vm0, %v1374_v18 }
 0x2cb   :  { %999 = vmatmul.msk.f32.gmra.mxu1 %vm88_vm0, %v1378_v19 }
 0x2d3   :  { %1012 = vmatmul.msk.f32.vlgmr.msrb.gmra.mxu1 %vm88_vm0, %v1515_v20 }
 0x2db   :  { %1013 = vmatmul.msk.f32.gmra.mxu1 %vm88_vm0, %v1519_v23 }
 0x2e3   :  { %1014 = vmatmul.msk.f32.gmra.mxu1 %vm88_vm0, %v1523_v24 }
 0x2eb   :  { %1015 = vmatmul.msk.f32.gmra.mxu1 %vm88_vm0, %v1527_v25 }
 0x330   :  { %v468_v27 = vpop.f32.mrf.mxu1 }
 0x331   :  { %v469_v29 = vadd.f32 %v468_v27, %v447_v26  ;;  %v712_v26 = vld [vmem:[#allocation2 + $0x58] sm:$0xff] }
 0x333   :  { %1091 = vtanh.f32 %v469_v29  ;;  %v711_v29 = vld [vmem:[#allocation2 + $0x50] sm:$0xff] }
 0x338   :  { %v471_v21 = vpop.f32.mrf.mxu1 }
 0x339   :  { %v1092_v22 = vpop.eup %1091  ;;  %v472_v28 = vadd.f32 %v471_v21, %v448_v31  ;;  %v710_v21 = vld [vmem:[#allocation2 + $0x48] sm:$0xff] }
 0x33a   :  { %485 = vst.msk [vmem:[#allocation2 + $0x80] sm:$0xff] %vm88_vm0, %v1092_v22 }
 0x33b   :  { %1093 = vtanh.f32 %v472_v28  ;;  %v709_v28 = vld [vmem:[#allocation2 + $0x40] sm:$0xff] }
 0x340   :  { %v474_v32 = vpop.f32.mrf.mxu1 }
 0x341   :  { %v1094_v33 = vpop.eup %1093  ;;  %v475_v34 = vadd.f32 %v474_v32, %v449_v30  ;;  %v785_v49 = vld [vmem:[#allocation2 + $0x80] sm:$0xff] }
 0x342   :  { %486 = vst.msk [vmem:[#allocation2 + $0x88] sm:$0xff] %vm88_vm0, %v1094_v33 }
 0x343   :  { %1095 = vtanh.f32 %v475_v34 }
 0x348   :  { %v477_v36 = vpop.f32.mrf.mxu1 }
 0x349   :  { %v1096_v37 = vpop.eup %1095  ;;  %v478_v38 = vadd.f32 %v477_v36, %v450_v35  ;;  %v786_v47 = vld [vmem:[#allocation2 + $0x88] sm:$0xff]  ;;  %v533_v36 = vld [vmem:[#allocation3 + $0xc0] sm:$0xff] }
 0x34a   :  { %487 = vst.msk [vmem:[#allocation2 + $0x90] sm:$0xff] %vm88_vm0, %v1096_v37 }
 0x34b   :  { %1097 = vtanh.f32 %v478_v38 }
 0x350   :  { %v1534_v39 = vpop.f32.mrf.mxu1 }
 0x351   :  { %v1098_v40 = vpop.eup %1097  ;;  %v787_v45 = vld [vmem:[#allocation2 + $0x90] sm:$0xff] }
 0x352   :  { %488 = vst.msk [vmem:[#allocation2 + $0x98] sm:$0xff] %vm88_vm0, %v1098_v40  ;;  %506 = vmatpush.msrb.mxu2 %v1098_v40  ;;  %v534_v40 = vld [vmem:[#allocation3 + $0xc8] sm:$0xff] }
 0x354   :  { %507 = vmatpush.msrb.mxu2 %v1096_v37 }
 0x356   :  { %508 = vmatpush.msrb.mxu2 %v1094_v33 }
 0x358   :  { %509 = vmatpush.msrb.mxu2 %v1092_v22  ;;  %v1537_v41 = vpop.f32.mrf.mxu1 }
 0x359   :  { %1000 = vmatmul.msk.f32.vlgmr.msrb.gmra.mxu2 %vm88_vm0, %v1345_v9  ;;  %v788_v43 = vld [vmem:[#allocation2 + $0x98] sm:$0xff] }
 0x35a   :  { %687 = vmatpush.msra.mxu2 %v674_v42  ;;  %801 = vmatpush.msra.mxu1 %v788_v43 }
 0x35c   :  { %688 = vmatpush.msra.mxu2 %v673_v44  ;;  %802 = vmatpush.msra.mxu1 %v787_v45 }
 0x35e   :  { %689 = vmatpush.msra.mxu2 %v672_v46  ;;  %803 = vmatpush.msra.mxu1 %v786_v47  ;;  %v535_v46 = vld [vmem:[#allocation3 + $0xd0] sm:$0xff] }
 0x360   :  { %690 = vmatpush.msra.mxu2 %v671_v48  ;;  %v661_v51 = vpop.f32.mrf.mxu1  ;;  %804 = vmatpush.msra.mxu1 %v785_v49 }
 0x361   :  { %v662_v52 = vadd.f32 %v661_v51, %v1541_v50  ;;  %1001 = vmatmul.msk.f32.gmra.mxu2 %vm88_vm0, %v1363_v15  ;;  %1028 = vmatmul.msk.f32.vlgmr.msra.gmra.mxu1 %vm88_vm0, %v1515_v20 }
 0x363   :  { %669 = vst.msk [vmem:[#allocation10 + $0x10] sm:$0xff] %vm88_vm0, %v662_v52  ;;  %v536_v52 = vld [vmem:[#allocation3 + $0xd8] sm:$0xff] }
 0x368   :  { %v664_v54 = vpop.f32.mrf.mxu1 }
 0x369   :  { %v665_v55 = vadd.f32 %v664_v54, %v1549_v53  ;;  %1002 = vmatmul.msk.f32.gmra.mxu2 %vm88_vm0, %v1374_v18  ;;  %1029 = vmatmul.msk.f32.gmra.mxu1 %vm88_vm0, %v1519_v23 }
 0x36b   :  { %670 = vst.msk [vmem:[#allocation10 + $0x18] sm:$0xff] %vm88_vm0, %v665_v55 }
 0x371   :  { %1003 = vmatmul.msk.f32.gmra.mxu2 %vm88_vm0, %v1378_v19  ;;  %1030 = vmatmul.msk.f32.gmra.mxu1 %vm88_vm0, %v1523_v24 }
 0x379   :  { %1016 = vmatmul.msk.f32.vlgmr.msra.gmra.mxu2 %vm88_vm0, %v1515_v20  ;;  %1031 = vmatmul.msk.f32.gmra.mxu1 %vm88_vm0, %v1527_v25 }
 0x381   :  { %1017 = vmatmul.msk.f32.gmra.mxu2 %vm88_vm0, %v1519_v23 }
 0x389   :  { %1018 = vmatmul.msk.f32.gmra.mxu2 %vm88_vm0, %v1523_v24 }
 0x391   :  { %1019 = vmatmul.msk.f32.gmra.mxu2 %vm88_vm0, %v1527_v25 }
 0x3dc   :  { %v511_v57 = vpop.f32.mrf.mxu2 }
 0x3dd   :  { %v512_v58 = vadd.f32 %v511_v57, %v490_v56 }
 0x3de   :  { %v1571_v59 = vpop.f32.mrf.mxu1 }
 0x3df   :  { %1099 = vtanh.f32 %v512_v58 }
 0x3e4   :  { %v514_v61 = vpop.f32.mrf.mxu2 }
 0x3e5   :  { %v1100_v62 = vpop.eup %1099  ;;  %v515_v63 = vadd.f32 %v514_v61, %v491_v60 }
 0x3e6   :  { %528 = vst.msk [vmem:[#allocation2 + $0xa0] sm:$0xff] %vm88_vm0, %v1100_v62  ;;  %v1574_v0 = vpop.f32.mrf.mxu1 }
 0x3e7   :  { %1101 = vtanh.f32 %v515_v63 }
 0x3ec   :  { %v517_v2 = vpop.f32.mrf.mxu2 }
 0x3ed   :  { %v1102_v3 = vpop.eup %1101  ;;  %v518_v4 = vadd.f32 %v517_v2, %v492_v1  ;;  %v823_v30 = vld [vmem:[#allocation2 + $0xa0] sm:$0xff]  ;;  %v750_v2 = vld [vmem:[#allocation2 + $0x78] sm:$0xff] }
 0x3ee   :  { %529 = vst.msk [vmem:[#allocation2 + $0xa8] sm:$0xff] %vm88_vm0, %v1102_v3  ;;  %v812_v5 = vpop.f32.mrf.mxu1 }
 0x3ef   :  { %1103 = vtanh.f32 %v518_v4  ;;  %v813_v6 = vadd.f32 %v812_v5, %v1541_v50  ;;  %v749_v4 = vld [vmem:[#allocation2 + $0x70] sm:$0xff] }
 0x3f1   :  { %821 = vst.msk [vmem:[#allocation10 + $0x90] sm:$0xff] %vm88_vm0, %v813_v6  ;;  %v748_v6 = vld [vmem:[#allocation2 + $0x68] sm:$0xff] }
 0x3f4   :  { %v520_v8 = vpop.f32.mrf.mxu2 }
 0x3f5   :  { %v1104_v10 = vpop.eup %1103  ;;  %v521_v11 = vadd.f32 %v520_v8, %v493_v7  ;;  %v824_v22 = vld [vmem:[#allocation2 + $0xa8] sm:$0xff]  ;;  %v747_v8 = vld [vmem:[#allocation2 + $0x60] sm:$0xff] }
 0x3f6   :  { %530 = vst.msk [vmem:[#allocation2 + $0xb0] sm:$0xff] %vm88_vm0, %v1104_v10  ;;  %v815_v12 = vpop.f32.mrf.mxu1 }
 0x3f7   :  { %1105 = vtanh.f32 %v521_v11  ;;  %v816_v13 = vadd.f32 %v815_v12, %v1549_v53 }
 0x3f9   :  { %822 = vst.msk [vmem:[#allocation10 + $0x98] sm:$0xff] %vm88_vm0, %v816_v13 }
 0x3fc   :  { %v1582_v14 = vpop.f32.mrf.mxu2 }
 0x3fd   :  { %v1106_v16 = vpop.eup %1105  ;;  %v825_v31 = vld [vmem:[#allocation2 + $0xb0] sm:$0xff] }
 0x3fe   :  { %531 = vst.msk [vmem:[#allocation2 + $0xb8] sm:$0xff] %vm88_vm0, %v1106_v16  ;;  %549 = vmatpush.msrb.mxu3 %v1106_v16  ;;  %v577_v16 = vld [vmem:[#allocation3 + $0xe8] sm:$0xff] }
 0x400   :  { %550 = vmatpush.msrb.mxu3 %v1104_v10 }
 0x402   :  { %551 = vmatpush.msrb.mxu3 %v1102_v3 }
 0x404   :  { %552 = vmatpush.msrb.mxu3 %v1100_v62  ;;  %v1585_v17 = vpop.f32.mrf.mxu2 }
 0x405   :  { %1004 = vmatmul.msk.f32.vlgmr.msrb.gmra.mxu3 %vm88_vm0, %v1345_v9  ;;  %v826_v27 = vld [vmem:[#allocation2 + $0xb8] sm:$0xff] }
 0x406   :  { %725 = vmatpush.msra.mxu3 %v712_v26  ;;  %839 = vmatpush.msrb.mxu2 %v826_v27 }
 0x408   :  { %726 = vmatpush.msra.mxu3 %v711_v29  ;;  %840 = vmatpush.msrb.mxu2 %v825_v31 }
 0x40a   :  { %727 = vmatpush.msra.mxu3 %v710_v21  ;;  %841 = vmatpush.msrb.mxu2 %v824_v22  ;;  %v578_v21 = vld [vmem:[#allocation3 + $0xf0] sm:$0xff] }
 0x40c   :  { %728 = vmatpush.msra.mxu3 %v709_v28  ;;  %v698_v32 = vpop.f32.mrf.mxu2  ;;  %842 = vmatpush.msrb.mxu2 %v823_v30 }
 0x40d   :  { %v699_v33 = vadd.f32 %v698_v32, %v1541_v50  ;;  %1005 = vmatmul.msk.f32.gmra.mxu3 %vm88_vm0, %v1363_v15  ;;  %1032 = vmatmul.msk.f32.vlgmr.msrb.gmra.mxu2 %vm88_vm0, %v1515_v20 }
 0x40f   :  { %707 = vst.msk [vmem:[#allocation10 + $0x30] sm:$0xff] %vm88_vm0, %v699_v33  ;;  %v579_v33 = vld [vmem:[#allocation3 + $0xf8] sm:$0xff] }
 0x414   :  { %v701_v34 = vpop.f32.mrf.mxu2 }
 0x415   :  { %v702_v35 = vadd.f32 %v701_v34, %v1549_v53  ;;  %1006 = vmatmul.msk.f32.gmra.mxu3 %vm88_vm0, %v1374_v18  ;;  %1033 = vmatmul.msk.f32.gmra.mxu2 %vm88_vm0, %v1519_v23 }
 0x417   :  { %708 = vst.msk [vmem:[#allocation10 + $0x38] sm:$0xff] %vm88_vm0, %v702_v35 }
 0x41d   :  { %1007 = vmatmul.msk.f32.gmra.mxu3 %vm88_vm0, %v1378_v19  ;;  %1034 = vmatmul.msk.f32.gmra.mxu2 %vm88_vm0, %v1523_v24 }
 0x425   :  { %1020 = vmatmul.msk.f32.vlgmr.msra.gmra.mxu3 %vm88_vm0, %v1515_v20  ;;  %1035 = vmatmul.msk.f32.gmra.mxu2 %vm88_vm0, %v1527_v25 }
 0x42d   :  { %1021 = vmatmul.msk.f32.gmra.mxu3 %vm88_vm0, %v1519_v23 }
 0x435   :  { %1022 = vmatmul.msk.f32.gmra.mxu3 %vm88_vm0, %v1523_v24 }
 0x43d   :  { %1023 = vmatmul.msk.f32.gmra.mxu3 %vm88_vm0, %v1527_v25 }
 0x488   :  { %v554_v37 = vpop.f32.mrf.mxu3 }
 0x489   :  { %v555_v38 = vadd.f32 %v554_v37, %v533_v36 }
 0x48b   :  { %1107 = vtanh.f32 %v555_v38 }
 0x490   :  { %v557_v42 = vpop.f32.mrf.mxu3  ;;  %v1615_v43 = vpop.f32.mrf.mxu2 }
 0x491   :  { %v1108_v44 = vpop.eup %1107  ;;  %v558_v45 = vadd.f32 %v557_v42, %v534_v40 }
 0x492   :  { %571 = vst.msk [vmem:[#allocation2 + $0xc0] sm:$0xff] %vm88_vm0, %v1108_v44 }
 0x493   :  { %1109 = vtanh.f32 %v558_v45 }
 0x498   :  { %v560_v47 = vpop.f32.mrf.mxu3  ;;  %v1618_v48 = vpop.f32.mrf.mxu2 }
 0x499   :  { %v1110_v49 = vpop.eup %1109  ;;  %v561_v51 = vadd.f32 %v560_v47, %v535_v46  ;;  %v861_v10 = vld [vmem:[#allocation2 + $0xc0] sm:$0xff] }
 0x49a   :  { %572 = vst.msk [vmem:[#allocation2 + $0xc8] sm:$0xff] %vm88_vm0, %v1110_v49 }
 0x49b   :  { %1111 = vtanh.f32 %v561_v51 }
 0x4a0   :  { %v563_v54 = vpop.f32.mrf.mxu3  ;;  %v850_v55 = vpop.f32.mrf.mxu2 }
 0x4a1   :  { %v1112_v56 = vpop.eup %1111  ;;  %v564_v57 = vadd.f32 %v563_v54, %v536_v52  ;;  %v851_v58 = vadd.f32 %v850_v55, %v1541_v50  ;;  %v862_v7 = vld [vmem:[#allocation2 + $0xc8] sm:$0xff] }
 0x4a2   :  { %573 = vst.msk [vmem:[#allocation2 + $0xd0] sm:$0xff] %vm88_vm0, %v1112_v56  ;;  %v237_v55 = vld [vmem:[%s1743_s6 + $0x8] sm:$0xff] }
 0x4a3   :  { %1113 = vtanh.f32 %v564_v57  ;;  %859 = vst.msk [vmem:[#allocation10 + $0xb0] sm:$0xff] %vm88_vm0, %v851_v58 }
 0x4a8   :  { %v1624_v60 = vpop.f32.mrf.mxu3  ;;  %v853_v61 = vpop.f32.mrf.mxu2 }
 0x4a9   :  { %v1114_v62 = vpop.eup %1113  ;;  %v854_v63 = vadd.f32 %v853_v61, %v1549_v53  ;;  %v863_v5 = vld [vmem:[#allocation2 + $0xd0] sm:$0xff] }
 0x4aa   :  { %574 = vst.msk [vmem:[#allocation2 + $0xd8] sm:$0xff] %vm88_vm0, %v1114_v62  ;;  %592 = vmatpush.msra.mxu0 %v1114_v62 }
 0x4ab   :  { %860 = vst.msk [vmem:[#allocation10 + $0xb8] sm:$0xff] %vm88_vm0, %v854_v63 }
 0x4ac   :  { %593 = vmatpush.msra.mxu0 %v1112_v56 }
 0x4ae   :  { %594 = vmatpush.msra.mxu0 %v1110_v49  ;;  %v236_v49 = vld [vmem:[%s1743_s6] sm:$0xff]  ;;  %s1257_s6 = smov [#allocation11]  }
 0x4af   :  { %242 = vperm.xlu2 %1058, %v236_v49   ;;  %s954_s25 = sshll.u32 %s1257_s6, 4  ;;  %s955_s25 = int_to_ptr.vmem [resolvable:$true] %s954_s25 }
 0x4b0   :  { %595 = vmatpush.msra.mxu0 %v1108_v44  ;;  %v1629_v1 = vpop.f32.mrf.mxu3 }
 0x4b1   :  { %1008 = vmatmul.msk.f32.vlgmr.msra.gmra.mxu0 %vm88_vm0, %v1345_v9  ;;  %v864_v3 = vld [vmem:[#allocation2 + $0xd8] sm:$0xff] }
 0x4b2   :  { %763 = vmatpush.msrb.mxu0 %v750_v2  ;;  %877 = vmatpush.msrb.mxu3 %v864_v3 }
 0x4b4   :  { %764 = vmatpush.msrb.mxu0 %v749_v4  ;;  %878 = vmatpush.msrb.mxu3 %v863_v5 }
 0x4b6   :  { %765 = vmatpush.msrb.mxu0 %v748_v6  ;;  %879 = vmatpush.msrb.mxu3 %v862_v7 }
 0x4b7   :  { %247 = vperm.xlu2 %1058, %v237_v55  }
 0x4b8   :  { %766 = vmatpush.msrb.mxu0 %v747_v8  ;;  %v736_v11 = vpop.f32.mrf.mxu3  ;;  %880 = vmatpush.msrb.mxu3 %v861_v10 }
 0x4b9   :  { %v737_v12 = vadd.f32 %v736_v11, %v1541_v50  ;;  %1009 = vmatmul.msk.f32.gmra.mxu0 %vm88_vm0, %v1363_v15  ;;  %1036 = vmatmul.msk.f32.vlgmr.msrb.gmra.mxu3 %vm88_vm0, %v1515_v20  ;;  %v576_v15 = vld [vmem:[#allocation3 + $0xe0] sm:$0xff] }
 0x4bb   :  { %745 = vst.msk [vmem:[#allocation10 + $0x50] sm:$0xff] %vm88_vm0, %v737_v12 }
 0x4c0   :  { %v739_v9 = vpop.f32.mrf.mxu3 }
 0x4c1   :  { %v740_v13 = vadd.f32 %v739_v9, %v1549_v53  ;;  %1010 = vmatmul.msk.f32.gmra.mxu0 %vm88_vm0, %v1374_v18  ;;  %1037 = vmatmul.msk.f32.gmra.mxu3 %vm88_vm0, %v1519_v23 }
 0x4c3   :  { %746 = vst.msk [vmem:[#allocation10 + $0x58] sm:$0xff] %vm88_vm0, %v740_v13 }
 0x4c9   :  { %1011 = vmatmul.msk.f32.gmra.mxu0 %vm88_vm0, %v1378_v19  ;;  %1038 = vmatmul.msk.f32.gmra.mxu3 %vm88_vm0, %v1523_v24 }
 0x4d1   :  { %1024 = vmatmul.msk.f32.vlgmr.msrb.gmra.mxu0 %vm88_vm0, %v1515_v20  ;;  %1039 = vmatmul.msk.f32.gmra.mxu3 %vm88_vm0, %v1527_v25 }
 0x4d9   :  { %1025 = vmatmul.msk.f32.gmra.mxu0 %vm88_vm0, %v1519_v23 }
 0x4e1   :  { %1026 = vmatmul.msk.f32.gmra.mxu0 %vm88_vm0, %v1523_v24 }
 0x4e9   :  { %1027 = vmatmul.msk.f32.gmra.mxu0 %vm88_vm0, %v1527_v25 }
 0x52e   :  { %v597_v18 = vpop.f32.mrf.mxu0 }
 0x52f   :  { %v598_v19 = vadd.f32 %v597_v18, %v576_v15 }
 0x531   :  { %1115 = vtanh.f32 %v598_v19 }
 0x536   :  { %v600_v26 = vpop.f32.mrf.mxu0 }
 0x537   :  { %v1116_v27 = vpop.eup %1115  ;;  %v601_v29 = vadd.f32 %v600_v26, %v577_v16 }
 0x538   :  { %614 = vst.msk [vmem:[#allocation2 + $0xe0] sm:$0xff] %vm88_vm0, %v1116_v27 }
 0x539   :  { %618 = vst.msk [vmem:[#allocation11] sm:$0xff] %vm88_vm0, %v1116_v27  ;;  %1117 = vtanh.f32 %v601_v29 }
 0x53c   :  { %v1661_v31 = vpop.f32.mrf.mxu3 }
 0x53e   :  { %v603_v22 = vpop.f32.mrf.mxu0 }
 0x53f   :  { %v1118_v28 = vpop.eup %1117  ;;  %v604_v30 = vadd.f32 %v603_v22, %v578_v21  ;;  %v899_v54 = vld [vmem:[#allocation2 + $0xe0] sm:$0xff] }
 0x540   :  { %615 = vst.msk [vmem:[#allocation2 + $0xe8] sm:$0xff] %vm88_vm0, %v1118_v28 }
 0x541   :  { %619 = vst.msk [vmem:[#allocation11 + $0x8] sm:$0xff] %vm88_vm0, %v1118_v28  ;;  %1119 = vtanh.f32 %v604_v30 }
 0x544   :  { %v1665_v32 = vpop.f32.mrf.mxu3 }
 0x546   :  { %v606_v34 = vpop.f32.mrf.mxu0 }
 0x547   :  { %v1120_v35 = vpop.eup %1119  ;;  %v607_v36 = vadd.f32 %v606_v34, %v579_v33  ;;  %v900_v52 = vld [vmem:[#allocation2 + $0xe8] sm:$0xff] }
 0x548   :  { %616 = vst.msk [vmem:[#allocation2 + $0xf0] sm:$0xff] %vm88_vm0, %v1120_v35 }
 0x549   :  { %620 = vst.msk [vmem:[#allocation11 + $0x10] sm:$0xff] %vm88_vm0, %v1120_v35  ;;  %1121 = vtanh.f32 %v607_v36 }
 0x54c   :  { %v888_v37 = vpop.f32.mrf.mxu3 }
 0x54d   :  { %v889_v38 = vadd.f32 %v888_v37, %v1541_v50 }
 0x54e   :  { %v768_v40 = vpop.f32.mrf.mxu0 }
 0x54f   :  { %v1122_v42 = vpop.eup %1121  ;;  %897 = vst.msk [vmem:[#allocation10 + $0xd0] sm:$0xff] %vm88_vm0, %v889_v38  ;;  %v901_v51 = vld [vmem:[#allocation2 + $0xf0] sm:$0xff] }
 0x550   :  { %617 = vst.msk [vmem:[#allocation2 + $0xf8] sm:$0xff] %vm88_vm0, %v1122_v42 }
 0x551   :  { %621 = vst.msk [vmem:[#allocation11 + $0x18] sm:$0xff] %vm88_vm0, %v1122_v42 }
 0x552   :  { %962 = dma.vmem_to_hbm [thread:$0]  %s955_s25, 512, %s957_s28, [#allocation12], %s1252_s13, %s1252_s13, %s1253_s14  }
 0x554   :  { %v891_v44 = vpop.f32.mrf.mxu3 }
 0x555   :  { %v892_v45 = vadd.f32 %v891_v44, %v1549_v53 }
 0x556   :  { %v771_v46 = vpop.f32.mrf.mxu0 }
 0x557   :  { %898 = vst.msk [vmem:[#allocation10 + $0xd8] sm:$0xff] %vm88_vm0, %v892_v45  ;;  %v902_v47 = vld [vmem:[#allocation2 + $0xf8] sm:$0xff] }
 0x558   :  { %915 = vmatpush.msra.mxu0 %v902_v47 }
 0x55a   :  { %916 = vmatpush.msra.mxu0 %v901_v51 }
 0x55c   :  { %917 = vmatpush.msra.mxu0 %v900_v52 }
 0x55e   :  { %v774_v56 = vpop.f32.mrf.mxu0  ;;  %918 = vmatpush.msra.mxu0 %v899_v54 }
 0x55f   :  { %v775_v57 = vadd.f32 %v774_v56, %v1541_v50  ;;  %1040 = vmatmul.msk.f32.vlgmr.msra.gmra.mxu0 %vm88_vm0, %v1515_v20  ;;  %v243_v20 = vpop.permute.xlu2 %242 }
 0x560   :  { %v731_v62 = vadd.f32 %v1624_v60, %v243_v20  ;;  %v807_v63 = vadd.f32 %v1571_v59, %v243_v20  ;;  %v845_v2 = vadd.f32 %v1615_v43, %v243_v20  ;;  %v883_v3 = vadd.f32 %v1661_v31, %v243_v20 }
 0x561   :  { %783 = vst.msk [vmem:[#allocation10 + $0x70] sm:$0xff] %vm88_vm0, %v775_v57 }
 0x562   :  { %743 = vst.msk [vmem:[#allocation10 + $0x40] sm:$0xff] %vm88_vm0, %v731_v62 }
 0x563   :  { %819 = vst.msk [vmem:[#allocation10 + $0x80] sm:$0xff] %vm88_vm0, %v807_v63 }
 0x564   :  { %857 = vst.msk [vmem:[#allocation10 + $0xa0] sm:$0xff] %vm88_vm0, %v845_v2 }
 0x565   :  { %895 = vst.msk [vmem:[#allocation10 + $0xc0] sm:$0xff] %vm88_vm0, %v883_v3 }
 0x566   :  { %v777_v58 = vpop.f32.mrf.mxu0 }
 0x567   :  { %v778_v61 = vadd.f32 %v777_v58, %v1549_v53  ;;  %1041 = vmatmul.msk.f32.gmra.mxu0 %vm88_vm0, %v1519_v23  ;;  %v656_v23 = vadd.f32 %v1534_v39, %v243_v20  ;;  %v248_v39 = vpop.permute.xlu2 %247 }
 0x568   :  { %v696_v59 = vadd.f32 %v1585_v17, %v248_v39  ;;  %v734_v60 = vadd.f32 %v1629_v1, %v248_v39  ;;  %v772_v43 = vadd.f32 %v771_v46, %v248_v39  ;;  %v810_v4 = vadd.f32 %v1574_v0, %v248_v39 }
 0x569   :  { %784 = vst.msk [vmem:[#allocation10 + $0x78] sm:$0xff] %vm88_vm0, %v778_v61  ;;  %v848_v5 = vadd.f32 %v1618_v48, %v248_v39  ;;  %v886_v6 = vadd.f32 %v1665_v32, %v248_v39 }
 0x56a   :  { %667 = vst.msk [vmem:[#allocation10] sm:$0xff] %vm88_vm0, %v656_v23 }
 0x56b   :  { %706 = vst.msk [vmem:[#allocation10 + $0x28] sm:$0xff] %vm88_vm0, %v696_v59 }
 0x56c   :  { %744 = vst.msk [vmem:[#allocation10 + $0x48] sm:$0xff] %vm88_vm0, %v734_v60 }
 0x56d   :  { %782 = vst.msk [vmem:[#allocation10 + $0x68] sm:$0xff] %vm88_vm0, %v772_v43 }
 0x56e   :  { %820 = vst.msk [vmem:[#allocation10 + $0x88] sm:$0xff] %vm88_vm0, %v810_v4 }
 0x56f   :  { %1042 = vmatmul.msk.f32.gmra.mxu0 %vm88_vm0, %v1523_v24  ;;  %v693_v24 = vadd.f32 %v1582_v14, %v243_v20  ;;  %v659_v14 = vadd.f32 %v1537_v41, %v248_v39  ;;  %858 = vst.msk [vmem:[#allocation10 + $0xa8] sm:$0xff] %vm88_vm0, %v848_v5 }
 0x570   :  { %896 = vst.msk [vmem:[#allocation10 + $0xc8] sm:$0xff] %vm88_vm0, %v886_v6 }
 0x571   :  { %705 = vst.msk [vmem:[#allocation10 + $0x20] sm:$0xff] %vm88_vm0, %v693_v24 }
 0x572   :  { %668 = vst.msk [vmem:[#allocation10 + $0x8] sm:$0xff] %vm88_vm0, %v659_v14 }
 0x577   :  { %1043 = vmatmul.msk.f32.gmra.mxu0 %vm88_vm0, %v1527_v25  ;;  %v769_v25 = vadd.f32 %v768_v40, %v243_v20 }
 0x579   :  { %781 = vst.msk [vmem:[#allocation10 + $0x60] sm:$0xff] %vm88_vm0, %v769_v25 }
 0x5dc   :  { %v920_v41 = vpop.f32.mrf.mxu0 }
 0x5dd   :  { %v921_v17 = vadd.f32 %v920_v41, %v243_v20 }
 0x5df   :  { %933 = vst.msk [vmem:[#allocation10 + $0xe0] sm:$0xff] %vm88_vm0, %v921_v17 }
 0x5e4   :  { %v923_v0 = vpop.f32.mrf.mxu0 }
 0x5e5   :  { %v924_v1 = vadd.f32 %v923_v0, %v248_v39 }
 0x5e7   :  { %934 = vst.msk [vmem:[#allocation10 + $0xe8] sm:$0xff] %vm88_vm0, %v924_v1 }
 0x5ec   :  { %v926_v48 = vpop.f32.mrf.mxu0 }
 0x5ed   :  { %v927_v7 = vadd.f32 %v926_v48, %v1541_v50 }
 0x5ef   :  { %935 = vst.msk [vmem:[#allocation10 + $0xf0] sm:$0xff] %vm88_vm0, %v927_v7 }
 0x5f4   :  { %v929_v8 = vpop.f32.mrf.mxu0 }
 0x5f5   :  { %v930_v10 = vadd.f32 %v929_v8, %v1549_v53 }
 0x5f7   :  { %936 = vst.msk [vmem:[#allocation10 + $0xf8] sm:$0xff] %vm88_vm0, %v930_v10 }
 0x5f8   :  { %949 = dma.vmem_to_hbm [thread:$0]  %s942_s29, 4096, %s944_s10, [#allocation6], %s1252_s13, %s1252_s13, %s1253_s14  }
 0x5f9   :  { %1247 = dma.done.wait [#allocation6], 4096  }
 0x5fa   :  { %1248 = vsyncadd [#allocation6], 4294963200 }
 0x5fb   :  { %1249 = dma.done.wait [#allocation12], 512  }
 0x5fc   :  { %1250 = vsyncadd [#allocation12], 4294966784 }
 0x5fd   :  { %971 = vsyncpa [#allocation5], 1 }
 0x5fe   :  { %972 = vsyncpa [#allocation8], 1 }
 0x5ff   :  { %973 = vsyncpa [#allocation6], 1 }
 0x600   :  { %974 = vsyncpa [#allocation12], 1 }

</bundles_post_ra>
